<compile_context>
chip_gen: v7x
topology: tpu7x:2x2x1
jax: 0.10.0
libtpu: 0.0.40
codegen_flags: <defaults>
</compile_context>

<pallas_src>
import math

import jax
import jax.numpy as jnp
from jax.experimental import pallas as pl
from jax.experimental.pallas import tpu as pltpu


def _round_up(x, m):
    return ((x + m - 1) // m) * m


# Conservative scoped-VMEM limit (safe on v7x's 64 MiB physical VMEM; fine on
# v5e/v6e) and a per-batch-row VMEM estimate used to cap the batch tile:
#   double-buffered f32 x block (32 lanes padded to 128)        ~1.0 KiB/row
#   bf16 x copy + h1/h2 (f32+bf16, lane-padded) + (8,bt) slab   ~1.9 KiB/row
_VMEM_LIMIT_BYTES = 48 * 1024 * 1024
_VMEM_BYTES_PER_ROW = 3 * 1024


def _value_mlp_kernel(x_ref, w1_ref, b1_ref, w2_ref, b2_ref, w3t_ref, b3_ref, o_ref):
    cd = w1_ref.dtype                                   # compute dtype (bf16 by default)
    x = x_ref[...].astype(cd)                           # (bt, D_in); no-op if x already bf16

    h1 = jnp.dot(x, w1_ref[...], preferred_element_type=jnp.float32) + b1_ref[...]
    h1 = jnp.maximum(h1, 0.0)                           # (bt, 64)  f32 elementwise (v5e-safe)

    h2 = jnp.dot(h1.astype(cd), w2_ref[...], preferred_element_type=jnp.float32) + b2_ref[...]
    h2 = jnp.maximum(h2, 0.0)                           # (bt, 32)  f32 elementwise

    # Final projection as an NT matmul so the batch stays on the lane axis:
    #   (8, 32) . (bt, 32)^T -> (8, bt); row 0 of w3t holds w3^T, rows 1..7 are zero.
    # TODO(synk): per review, verify in the bundle dump that this lowers to an XLU
    # transpose (not a materialized h2 relayout) and that the [0:1,:] slice is free;
    # if not, try an M=1 w3t or pl.dot(..., trans_b=True).
    out = jax.lax.dot_general(
        w3t_ref[...], h2.astype(cd),
        dimension_numbers=(((1,), (1,)), ((), ())),
        preferred_element_type=jnp.float32)             # (8, bt)
    o_ref[...] = (out[0:1, :] + b3_ref[...]).astype(o_ref.dtype)   # (1, bt), lane-dense


def pack_value_params(params, compute_dtype=jnp.bfloat16):
    """Pre-cast / pack weights once (hoisted out of the per-call path)."""
    w1, b1, w2, b2, w3, b3 = params
    w3t = jnp.pad(jnp.transpose(w3), ((0, 7), (0, 0))).astype(compute_dtype)   # (8, 32)
    return (w1.astype(compute_dtype), jnp.asarray(b1, jnp.float32),
            w2.astype(compute_dtype), jnp.asarray(b2, jnp.float32),
            w3t, jnp.asarray(b3, jnp.float32))


def _pick_batch_tile(B, max_bt):
    """Batch tile: as large as the VMEM budget allows, grid>=2 for big batches."""
    budget_rows = int(_VMEM_LIMIT_BYTES * 0.75) // _VMEM_BYTES_PER_ROW
    cap = max(128, min(int(max_bt), (budget_rows // 128) * 128))
    if B <= min(cap, 1024):
        return B                                # one full-extent block, no masking needed
    # >= 2 grid steps so v7x megacore can shard the batch across both TensorCores,
    # while tiles stay large enough to amortize per-grid-step overhead.
    return min(cap, _round_up(pl.cdiv(B, 2), 128))


def value_forward(state, packed_params, *, block_batch=8192):
    """Fused MLP value head.

    state: (..., n_obs*frame_stack), f32 or bf16 (bf16 halves the dominant HBM read).
    packed_params: output of pack_value_params.
    Returns (..., 1) float32.
    """
    w1c, b1, w2c, b2, w3t, b3 = packed_params

    lead = state.shape[:-1]
    d_in = state.shape[-1]
    x = state.reshape(-1, d_in)                 # fold any outer dims into the batch
    B = x.shape[0]

    bt = _pick_batch_tile(B, block_batch)
    grid = (pl.cdiv(B, bt),)
    const = lambda i: (0, 0)                    # weights/biases stay VMEM-resident

    out = pl.pallas_call(
        _value_mlp_kernel,
        out_shape=jax.ShapeDtypeStruct((1, B), jnp.float32),
        grid=grid,
        in_specs=[
            pl.BlockSpec((bt, d_in), lambda i: (i, 0)),   # streamed / pipelined state
            pl.BlockSpec(w1c.shape, const),
            pl.BlockSpec(b1.shape, const),
            pl.BlockSpec(w2c.shape, const),
            pl.BlockSpec(b2.shape, const),
            pl.BlockSpec(w3t.shape, const),
            pl.BlockSpec(b3.shape, const),
        ],
        out_specs=pl.BlockSpec((1, bt), lambda i: (0, i)),   # lane-dense output row
        compiler_params=pltpu.CompilerParams(
            dimension_semantics=("parallel",),
            vmem_limit_bytes=_VMEM_LIMIT_BYTES),
    )(x, w1c, b1, w2c, b2, w3t, b3)

    return out.reshape(*lead, 1)


def init_value_params(key, n_observations, hidden_sizes=(64, 32), frame_stack=1):
    """Deterministic init matching torch.nn.Linear defaults:
    W, b ~ U(-1/sqrt(fan_in), 1/sqrt(fan_in)); weights stored as (in, out)."""
    dims = [n_observations * frame_stack, *hidden_sizes, 1]
    params = []
    for i in range(len(dims) - 1):
        fan_in, fan_out = dims[i], dims[i + 1]
        bound = 1.0 / math.sqrt(fan_in)
        key, kw, kb = jax.random.split(key, 3)
        w = jax.random.uniform(kw, (fan_in, fan_out), jnp.float32, -bound, bound)
        b = jax.random.uniform(kb, (1, fan_out), jnp.float32, -bound, bound)
        params.extend([w, b])
    return tuple(params)


def _reference_forward(state, params, compute_dtype=None):
    w1, b1, w2, b2, w3, b3 = params
    c = (lambda a: a.astype(compute_dtype)) if compute_dtype is not None else (lambda a: a)
    h1 = jnp.maximum(jnp.dot(c(state), c(w1), preferred_element_type=jnp.float32) + b1, 0.0)
    h2 = jnp.maximum(jnp.dot(c(h1), c(w2), preferred_element_type=jnp.float32) + b2, 0.0)
    return jnp.dot(c(h2), c(w3), preferred_element_type=jnp.float32) + b3


if __name__ == "__main__":
    key = jax.random.PRNGKey(0)
    n_obs, frame_stack = 32, 1

    k_params, k_small, k_big = jax.random.split(key, 3)
    params = init_value_params(k_params, n_obs, hidden_sizes=(64, 32),
                               frame_stack=frame_stack)
    packed = pack_value_params(params)          # weight prep hoisted out of the call path

    # Small inference-style batch (single full-extent block, no masking).
    state_small = jax.random.normal(k_small, (8, n_obs * frame_stack), jnp.float32)
    out_small = jax.block_until_ready(value_forward(state_small, packed))
    assert out_small.shape == (8, 1), out_small.shape

    # Larger batch exercising the tiled / pipelined grid path (grid=2 for megacore,
    # partial last block handled by Pallas masking — no wrapper pad copy).
    state_big = jax.random.normal(k_big, (2000, n_obs * frame_stack), jnp.float32)
    out_big = jax.block_until_ready(value_forward(state_big, packed))
    assert out_big.shape == (2000, 1), out_big.shape

    for state, out in ((state_small, out_small), (state_big, out_big)):
        ref_matched = _reference_forward(state, params, compute_dtype=jnp.bfloat16)
        ref_f32 = _reference_forward(state, params)
        assert jnp.allclose(out, ref_matched, atol=1e-3, rtol=1e-3), \
            "mismatch vs bf16-matched reference"
        assert jnp.allclose(out, ref_f32, atol=5e-2, rtol=5e-2), \
            "mismatch vs f32 module reference"

    # bf16 state fast path: halves the dominant HBM read; no wrapper cast is added.
    state_bf16 = state_big.astype(jnp.bfloat16)
    out_bf16 = jax.block_until_ready(value_forward(state_bf16, packed))
    ref_bf16 = _reference_forward(state_bf16, params, compute_dtype=jnp.bfloat16)
    assert jnp.allclose(out_bf16, ref_bf16, atol=1e-3, rtol=1e-3), \
        "mismatch vs bf16-state reference"

    print("KERNEL_OK")
</pallas_src>

<mosaic_0001>
module attributes {stable_mosaic.version = 11 : i64} {
  func.func @_value_mlp_kernel(%arg0: i32, %arg1: memref<8x32xf32, #tpu.memory_space<vmem>>, %arg2: memref<32x64xbf16, #tpu.memory_space<vmem>>, %arg3: memref<1x64xf32, #tpu.memory_space<vmem>>, %arg4: memref<64x32xbf16, #tpu.memory_space<vmem>>, %arg5: memref<1x32xf32, #tpu.memory_space<vmem>>, %arg6: memref<8x32xbf16, #tpu.memory_space<vmem>>, %arg7: memref<1x1xf32, #tpu.memory_space<vmem>>, %arg8: memref<1x8xf32, #tpu.memory_space<vmem>>) attributes {dimension_semantics = [#tpu.dimension_semantics<parallel>], iteration_bounds = array<i64: 1>, scalar_prefetch = 0 : i64, scratch_operands = 0 : i64, tpu.core_type = #tpu.core_type<tc>, window_params = [{transform_indices = @transform_0, window_bounds = array<i64: 8, 32>}, {pipeline_mode = #tpu.pipeline_mode<synchronous>, transform_indices = @transform_1, window_bounds = array<i64: 32, 64>}, {pipeline_mode = #tpu.pipeline_mode<synchronous>, transform_indices = @transform_2, window_bounds = array<i64: 1, 64>}, {pipeline_mode = #tpu.pipeline_mode<synchronous>, transform_indices = @transform_3, window_bounds = array<i64: 64, 32>}, {pipeline_mode = #tpu.pipeline_mode<synchronous>, transform_indices = @transform_4, window_bounds = array<i64: 1, 32>}, {pipeline_mode = #tpu.pipeline_mode<synchronous>, transform_indices = @transform_5, window_bounds = array<i64: 8, 32>}, {pipeline_mode = #tpu.pipeline_mode<synchronous>, transform_indices = @transform_6, window_bounds = array<i64: 1, 1>}, {transform_indices = @transform_7, window_bounds = array<i64: 1, 8>}]} {
    %c0 = arith.constant 0 : index
    %c0_0 = arith.constant 0 : index
    %0 = vector.load %arg1[%c0, %c0_0] : memref<8x32xf32, #tpu.memory_space<vmem>>, vector<8x32xf32>
    %1 = arith.truncf %0 : vector<8x32xf32> to vector<8x32xbf16>
    %c0_1 = arith.constant 0 : index
    %c0_2 = arith.constant 0 : index
    %2 = vector.load %arg2[%c0_1, %c0_2] : memref<32x64xbf16, #tpu.memory_space<vmem>>, vector<32x64xbf16>
    %cst = arith.constant dense<0.000000e+00> : vector<8x64xf32>
    %3 = tpu.matmul %1, %2, %cst {dimension_numbers = #tpu.dot_dimension_numbers<[1], [0], [0], [1], [0, 0, 1, 1], [], []>} : vector<8x32xbf16>, vector<32x64xbf16>, vector<8x64xf32> -> vector<8x64xf32>
    %c0_3 = arith.constant 0 : index
    %c0_4 = arith.constant 0 : index
    %4 = vector.load %arg3[%c0_3, %c0_4] : memref<1x64xf32, #tpu.memory_space<vmem>>, vector<1x64xf32>
    %5 = vector.broadcast %4 : vector<1x64xf32> to vector<8x64xf32>
    %6 = arith.addf %3, %5 : vector<8x64xf32>
    %cst_5 = arith.constant 0.000000e+00 : f32
    %7 = vector.broadcast %cst_5 : f32 to vector<8x64xf32>
    %8 = arith.maximumf %6, %7 : vector<8x64xf32>
    %9 = arith.truncf %8 : vector<8x64xf32> to vector<8x64xbf16>
    %c0_6 = arith.constant 0 : index
    %c0_7 = arith.constant 0 : index
    %10 = vector.load %arg4[%c0_6, %c0_7] : memref<64x32xbf16, #tpu.memory_space<vmem>>, vector<64x32xbf16>
    %cst_8 = arith.constant dense<0.000000e+00> : vector<8x32xf32>
    %11 = tpu.matmul %9, %10, %cst_8 {dimension_numbers = #tpu.dot_dimension_numbers<[1], [0], [0], [1], [0, 0, 1, 1], [], []>} : vector<8x64xbf16>, vector<64x32xbf16>, vector<8x32xf32> -> vector<8x32xf32>
    %c0_9 = arith.constant 0 : index
    %c0_10 = arith.constant 0 : index
    %12 = vector.load %arg5[%c0_9, %c0_10] : memref<1x32xf32, #tpu.memory_space<vmem>>, vector<1x32xf32>
    %13 = vector.broadcast %12 : vector<1x32xf32> to vector<8x32xf32>
    %14 = arith.addf %11, %13 : vector<8x32xf32>
    %cst_11 = arith.constant 0.000000e+00 : f32
    %15 = vector.broadcast %cst_11 : f32 to vector<8x32xf32>
    %16 = arith.maximumf %14, %15 : vector<8x32xf32>
    %c0_12 = arith.constant 0 : index
    %c0_13 = arith.constant 0 : index
    %17 = vector.load %arg6[%c0_12, %c0_13] : memref<8x32xbf16, #tpu.memory_space<vmem>>, vector<8x32xbf16>
    %18 = arith.truncf %16 : vector<8x32xf32> to vector<8x32xbf16>
    %cst_14 = arith.constant dense<0.000000e+00> : vector<8x8xf32>
    %19 = tpu.matmul %17, %18, %cst_14 {dimension_numbers = #tpu.dot_dimension_numbers<[1], [1], [0], [0], [0, 0, 1, 0], [], []>} : vector<8x32xbf16>, vector<8x32xbf16>, vector<8x8xf32> -> vector<8x8xf32>
    %20 = vector.extract_strided_slice %19 {offsets = [0, 0], sizes = [1, 8], strides = [1, 1]} : vector<8x8xf32> to vector<1x8xf32>
    %c0_15 = arith.constant 0 : index
    %c0_16 = arith.constant 0 : index
    %21 = vector.load %arg7[%c0_15, %c0_16] : memref<1x1xf32, #tpu.memory_space<vmem>>, vector<1x1xf32>
    %22 = vector.broadcast %21 : vector<1x1xf32> to vector<1x8xf32>
    %23 = arith.addf %20, %22 : vector<1x8xf32>
    %c0_17 = arith.constant 0 : index
    %c0_18 = arith.constant 0 : index
    %24 = vector.load %arg8[%c0_17, %c0_18] : memref<1x8xf32, #tpu.memory_space<vmem>>, vector<1x8xf32>
    tpu.vector_store %arg8[%c0_17, %c0_18], %23 {strides = array<i32>} : memref<1x8xf32, #tpu.memory_space<vmem>>, vector<1x8xf32>,
    return
  }
  func.func @transform_0(%arg0: i32) -> (i32, i32) {
    %c0_i32 = arith.constant 0 : i32
    %c0_i32_0 = arith.constant 0 : i32
    return %arg0, %c0_i32 : i32, i32
  }
  func.func @transform_1(%arg0: i32) -> (i32, i32) {
    %c0_i32 = arith.constant 0 : i32
    %c0_i32_0 = arith.constant 0 : i32
    %c0_i32_1 = arith.constant 0 : i32
    return %c0_i32, %c0_i32_0 : i32, i32
  }
  func.func @transform_2(%arg0: i32) -> (i32, i32) {
    %c0_i32 = arith.constant 0 : i32
    %c0_i32_0 = arith.constant 0 : i32
    %c0_i32_1 = arith.constant 0 : i32
    return %c0_i32, %c0_i32_0 : i32, i32
  }
  func.func @transform_3(%arg0: i32) -> (i32, i32) {
    %c0_i32 = arith.constant 0 : i32
    %c0_i32_0 = arith.constant 0 : i32
    %c0_i32_1 = arith.constant 0 : i32
    return %c0_i32, %c0_i32_0 : i32, i32
  }
  func.func @transform_4(%arg0: i32) -> (i32, i32) {
    %c0_i32 = arith.constant 0 : i32
    %c0_i32_0 = arith.constant 0 : i32
    %c0_i32_1 = arith.constant 0 : i32
    return %c0_i32, %c0_i32_0 : i32, i32
  }
  func.func @transform_5(%arg0: i32) -> (i32, i32) {
    %c0_i32 = arith.constant 0 : i32
    %c0_i32_0 = arith.constant 0 : i32
    %c0_i32_1 = arith.constant 0 : i32
    return %c0_i32, %c0_i32_0 : i32, i32
  }
  func.func @transform_6(%arg0: i32) -> (i32, i32) {
    %c0_i32 = arith.constant 0 : i32
    %c0_i32_0 = arith.constant 0 : i32
    %c0_i32_1 = arith.constant 0 : i32
    return %c0_i32, %c0_i32_0 : i32, i32
  }
  func.func @transform_7(%arg0: i32) -> (i32, i32) {
    %c0_i32 = arith.constant 0 : i32
    %c0_i32_0 = arith.constant 0 : i32
    return %c0_i32, %arg0 : i32, i32
  }
}

</mosaic_0001>

<bundles_post_ra>
// kernel: tpu_custom_call.1
= control target key start
LH: loop header
LB: loop body
LE: loop exit
PB: predicated region body
PF: predicated region fallthrough
CT: control target
= control target key end

     0   :  { %s437_s0 = inlined_call_operand.vmem [shape: f32[8,32], index: 0, kind: input, shape index: {}]   ;;  %s438_s1 = inlined_call_operand.vmem [shape: bf16[32,64], index: 1, kind: input, shape index: {}]   ;;  %s439_s2 = inlined_call_operand.vmem [shape: f32[1,64], index: 2, kind: input, shape index: {}]   ;;  %s440_s3 = inlined_call_operand.vmem [shape: bf16[64,32], index: 3, kind: input, shape index: {}]   ;;  %s441_s4 = inlined_call_operand.vmem [shape: f32[1,32], index: 4, kind: input, shape index: {}]   ;;  %s442_s5 = inlined_call_operand.vmem [shape: bf16[8,32], index: 5, kind: input, shape index: {}]   ;;  %s443_s6 = inlined_call_operand.<no memory space> [shape: f32[1,1], index: 6, kind: input, shape index: {}]   ;;  %s444_s7 = inlined_call_operand.hbm [shape: f32[1,8], index: 7, kind: output, shape index: {}]  }
   0x1   :  { %v12_v0 = vstv %s443_s6 }
   0x2   :  { %13 = vst [vmem:[#allocation2] sm:$0x1] %v12_v0 }
   0x3   :  { %v312_v1 = vld [vmem:[%s438_s1] sm:$0xff]   ;;  %v342_v2 = vmov 0.0   ;;  %v313_v3 = vld [vmem:[%s438_s1 + $0x8] sm:$0xff]   ;;  %vm343_vm0 = vmmov 0   ;;  %vm55_vm1 = vcmask 261120  }
   0x4   :  { %281 = vmatprep.subr.bf16.mxu0 %v342_v2  ;;  %289 = vmatprep.subr.bf16.mxu1 %v342_v2  ;;  %v30_v4 = vld [vmem:[%s437_s0] sm:$0xff]  ;;  %v315_v6 = vld [vmem:[%s440_s3 + $0x8] sm:$0xff]  }
   0x5   :  { %282 = vmatpush3.bf16.msra.mxu0 %v312_v1  ;;  %285 = vmatprep.mubr.msk.bf16.mxu0 %vm343_vm0, %v342_v2  ;;  %v314_v5 = vld [vmem:[%s440_s3] sm:$0xff]   ;;  %v31_v7 = vpack.c.bf16 %v30_v4, %v30_v4 }
   0x6   :  { %283 = vmatprep.subr.bf16.mxu0 %v342_v2  ;;  %297 = vmatprep.mubr.msk.bf16.mxu1 %vm343_vm0, %v342_v2 }
   0x7   :  { %290 = vmatpush3.bf16.msra.mxu1 %v314_v5 }
   0x8   :  { %291 = vmatprep.subr.bf16.mxu1 %v342_v2 }
   0x9   :  { %284 = vmatpush3.bf16.msra.mxu0 %v313_v3 }
   0xa   :  { %14 = vsyncpa [#allocation4], 0  ;;  %301 = vmatprep.subr.bf16.mxu0 %v342_v2  ;;  %v316_v8 = vld [vmem:[%s440_s3 + $0x10] sm:$0xff]   ;;  %v317_v9 = vld [vmem:[%s440_s3 + $0x18] sm:$0xff]   ;;  %vm140_vm2 = vcmask 523264   ;;  %v344_v19 = vmov 0   ;;  %v239_v30 = vlaneseq }
   0xb   :  { %292 = vmatpush3.bf16.msra.mxu1 %v315_v6  ;;  %v260_v10 = vld [vmem:[%s439_s2] ss:$0 sm:$0xff]  ;;  %311 = vset.pattern.permute.xlu0 %v344_v19  ;;  %vm244_vm3 = vcmask 57344  }
   0xc   :  { %286 = vmatmul.mubr.msk.bf16.vlgmr.msra.gmra.mrb[0].mxu0 %vm55_vm1, %v31_v7  ;;  %293 = vmatprep.subr.bf16.mxu1 %v342_v2  ;;  %v233_v18 = vld [vmem:[#allocation2] sm:$0x1]  ;;  %v240_v31 = vshrl.u32 %v239_v30, 7 }
   0xd   :  { %303 = vmatprep.mubr.msk.bf16.mxu0 %vm343_vm0, %v342_v2  ;;  %236 = vperm.xlu0 %311, %v233_v18   ;;  %v264_v20 = vld [vmem:[%s441_s4] ss:$0 sm:$0xff]  ;;  %s345_s4 = smov [#allocation3]  }
   0xe   :  { %v185_v29 = vld [vmem:[%s442_s5] sm:$0xf]  ;;  %v241_v32 = vsub.s32 0, %v240_v31  ;;  %s252_s18 = sshll.u32 %s345_s4, 4  ;;  %s253_s18 = int_to_ptr.vmem [resolvable:$true] %s252_s18 }
   0xf   :  { %294 = vmatpush3.bf16.msra.mxu1 %v316_v8  ;;  %s318_s19 = scalar_lea.vmem %s253_s18, 16  ;;  %s322_s5 = scalar_lea.vmem %s253_s18, 32 }
  0x10   :  { %295 = vmatprep.subr.bf16.mxu1 %v342_v2  ;;  %p319_p0 = scmp.ne.s32.totalorder %s253_s18, %s318_s19  ;;  %p323_p1 = scmp.lt.s32.totalorder %s253_s18, %s253_s18 }
  0x11   :  { %p324_p2 = scmp.lt.s32.totalorder %s322_s5, %s318_s19 }
  0x13   :  { %296 = vmatpush3.bf16.msra.mxu1 %v317_v9  ;;  %p325_p3 = por %p324_p2, %p323_p1 }
  0x15   :  { %p326_p4 = pnand %p325_p3, %p319_p0 }
  0x8c   :  { %v237_v33 = vpop.permute.xlu0 %236 }
  0x8d   :  { %v242_v34 = vrot.slane %v237_v33, %v241_v32 }
  0xdf   :  { %v93_v11 = vpop.f32.mrb[0].mxu0 }
  0xe0   :  { %v94_v12 = vadd.f32 %v260_v10, %v93_v11  ;;  %v287_v13 = vpop.f32.mrb[1].mxu0 }
  0xe1   :  { %v96_v14 = vpop.f32.mrb[2].mxu0 }
  0xe2   :  { %v99_v15 = vmax.f32 %v94_v12, 0.0  ;;  %v288_v16 = vpop.f32.mrb[3].mxu0 }
  0xe4   :  { %v100_v17 = vpack.c.bf16 %v99_v15, %v99_v15 }
  0xe6   :  { %298 = vmatmul.mubr.msk.bf16.vlgmr.msra.gmra.mrb[0].mxu1 %vm140_vm2, %v100_v17 }
 0x1b9   :  { %v178_v21 = vpop.f32.mrb[0].mxu1 }
 0x1ba   :  { %v179_v22 = vadd.f32 %v264_v20, %v178_v21  ;;  %v299_v23 = vpop.f32.mrb[1].mxu1 }
 0x1bb   :  { %v181_v24 = vpop.f32.mrb[2].mxu1 }
 0x1bc   :  { %v184_v25 = vmax.f32 %v179_v22, 0.0  ;;  %v300_v26 = vpop.f32.mrb[3].mxu1 }
 0x1be   :  { %v186_v27 = vpack.c.bf16 %v184_v25, %v184_v25 }
 0x1c0   :  { %v191_v28 = vsel %vm55_vm1, %v186_v27, 0 }
 0x1c1   :  { %302 = vmatpush3.bf16.xpose.msra.mxu0 %v191_v28 }
 0x1c8   :  { %304 = vmatmul.mubr.msk.bf16.vlgmr.msra.gmra.mrb[4].mxu0 %vm55_vm1, %v185_v29 }
 0x29b   :  { %v227_v35 = vpop.f32.mrb[4].mxu0 }
 0x29c   :  { %v243_v36 = vadd.f32 %v242_v34, %v227_v35  ;;  %v305_v37 = vpop.f32.mrb[5].mxu0 }
 0x29d   :  { %v230_v38 = vpop.f32.mrb[6].mxu0 }
 0x29e   :  { %v306_v39 = vpop.f32.mrb[7].mxu0  ;;  %245 = vst.msk [vmem:[#allocation3] sm:$0x1] %vm244_vm3, %v243_v36 }
 0x29f   :  { %329 = shalt.err (!%p326_p4)
}
 0x2a0   :  { %s330_s22 = scalar_lea.hbm %s444_s7, 16 }
 0x2a1   :  { %p331_p5 = scmp.ne.s32.totalorder %s444_s7, %s330_s22  ;;  %p334_p6 = scmp.lt.u32.totalorder %s330_s22, %s444_s7 }
 0x2a3   :  { %p336_p7 = pnand %p334_p6, %p331_p5 }
 0x2a5   :  { %339 = shalt.err (!%p336_p7)
}
 0x2a6   :  { %255 = dma.vmem_to_hbm [thread:$0]  %s253_s18, 16, %s444_s7, [#allocation4]  }
 0x2a7   :  { %340 = dma.done.wait [#allocation4], 16  }
 0x2a8   :  { %341 = vsyncadd [#allocation4], 4294967280 }
 0x2a9   :  { %259 = vsyncpa [#allocation4], 1 }

</bundles_post_ra>
